<compile_context>
chip_gen: v7x
topology: tpu7x:2x2x1
jax: 0.10.0
libtpu: 0.0.40
codegen_flags: <defaults>
</compile_context>

<pallas_src>
import jax
import jax.numpy as jnp
from jax.experimental import pallas as pl
from jax.experimental.pallas import tpu as pltpu


def _fusion_kernel(x8_ref, x16_ref, p_ref, w_ref, b_ref, out_ref):
    # x8_ref : (1, C8, HW)         stride-8 feature, NCHW with spatial flattened to lanes
    # x16_ref: (1, C16, R2)        stride-16 passthrough, NCHW with spatial flattened
    # p_ref  : (HW, R2)            2x2 average-pool matrix (0.25 entries)
    # w_ref  : (Cout, C8)          1x1-conv weight
    # b_ref  : (Cout, 1)           conv bias (broadcasts over lanes)
    # out_ref: (1, Cout + C16, R2) fused NCHW output (spatial flattened)
    cout = w_ref.shape[0]
    # AvgPool2d(2,2) as a matmul over the flattened spatial axis (f32 accumulate).
    pooled = jnp.dot(x8_ref[0], p_ref[...], preferred_element_type=jnp.float32)
    # 1x1 convolution: contract over channels (f32 accumulate), then add bias.
    adj = jnp.dot(w_ref[...], pooled.astype(w_ref.dtype),
                  preferred_element_type=jnp.float32)
    adj = adj + b_ref[...]
    # Channel concat in NCHW = two static sublane-range stores.
    out_ref[0, :cout, :] = adj.astype(out_ref.dtype)
    out_ref[0, cout:, :] = x16_ref[0].astype(out_ref.dtype)


def _pool_matrix(h, w, dtype):
    """(H*W, H2*W2) matrix P with P[hw, r] = 0.25 iff pixel hw pools into window r."""
    h2, w2 = h // 2, w // 2
    dest = (jnp.arange(h)[:, None] // 2) * w2 + (jnp.arange(w)[None, :] // 2)
    dest = dest.reshape(h * w)
    p = (dest[:, None] == jnp.arange(h2 * w2)[None, :]) * 0.25
    return p.astype(dtype)


def feature_fusion(feature_stride_8, feature_stride_16, weight, bias,
                   *, compute_dtype=None):
    """
    feature_stride_8 : (N, C8, H, W)    NCHW, like the PyTorch module
    feature_stride_16: (N, C16, H2, W2) NCHW, H2 = H // 2, W2 = W // 2
    weight           : (Cout, C8)       Conv2d 1x1 weight (spatial dims squeezed)
    bias             : (Cout,)
    compute_dtype    : MXU operand dtype; defaults to feature_stride_8.dtype (pass
                       bf16 features to halve HBM traffic on the dominant stream).
                       Accumulation is always f32.
    returns          : (N, Cout + C16, H2, W2) NCHW
    """
    n, c8, h, w = feature_stride_8.shape
    _, c16, h2, w2 = feature_stride_16.shape
    cout = weight.shape[0]
    assert h % 2 == 0 and w % 2 == 0, "AvgPool2d(2,2) expects even H, W"
    assert h2 == h // 2 and w2 == w // 2

    if compute_dtype is None:
        compute_dtype = feature_stride_8.dtype
    out_dtype = jnp.result_type(feature_stride_8.dtype, feature_stride_16.dtype)

    hw = h * w
    r2 = h2 * w2
    c_tot = cout + c16

    # Free reshapes only: collapse the trailing spatial dims into the lane axis.
    x8 = feature_stride_8.reshape(n, c8, hw).astype(compute_dtype)
    x16 = feature_stride_16.reshape(n, c16, r2).astype(out_dtype)

    p_mat = _pool_matrix(h, w, compute_dtype)              # (HW, R2)
    w2d = weight.astype(compute_dtype)                     # (Cout, C8)
    b_col = bias.reshape(cout, 1).astype(jnp.float32)      # (Cout, 1)

    out_flat = pl.pallas_call(
        _fusion_kernel,
        out_shape=jax.ShapeDtypeStruct((n, c_tot, r2), out_dtype),
        grid_spec=pltpu.PrefetchScalarGridSpec(
            num_scalar_prefetch=0,
            grid=(n,),
            in_specs=[
                pl.BlockSpec((1, c8, hw), lambda i: (i, 0, 0)),
                pl.BlockSpec((1, c16, r2), lambda i: (i, 0, 0)),
                pl.BlockSpec((hw, r2), lambda i: (0, 0)),
                pl.BlockSpec((cout, c8), lambda i: (0, 0)),
                pl.BlockSpec((cout, 1), lambda i: (0, 0)),
            ],
            out_specs=pl.BlockSpec((1, c_tot, r2), lambda i: (i, 0, 0)),
        ),
        compiler_params=pltpu.CompilerParams(
            dimension_semantics=("parallel",)),
    )(x8, x16, p_mat, w2d, b_col)

    # Free reshape back to the module's NCHW output convention.
    return out_flat.reshape(n, c_tot, h2, w2)


def _reference(feature_stride_8, feature_stride_16, weight, bias):
    # Pure-JAX reference for correctness check (NCHW semantics, matches PyTorch).
    n, c8, h, w = feature_stride_8.shape
    pooled = feature_stride_8.reshape(n, c8, h // 2, 2, w // 2, 2).mean(axis=(3, 5))
    adj = jnp.einsum("nchw,oc->nohw", pooled, weight) + bias[None, :, None, None]
    return jnp.concatenate([adj, feature_stride_16], axis=1)


if __name__ == "__main__":
    key = jax.random.PRNGKey(0)
    k1, k2, k3, k4 = jax.random.split(key, 4)

    # Module defaults: in_channels_stride_8=256, in_channels_stride_16=64, out_channels=64.
    N, C8, H, W = 2, 256, 16, 16
    C16, COUT = 64, 64
    H2, W2 = H // 2, W // 2

    feature_stride_8 = jax.random.normal(k1, (N, C8, H, W), dtype=jnp.float32)
    feature_stride_16 = jax.random.normal(k2, (N, C16, H2, W2), dtype=jnp.float32)

    # Deterministic synthetic parameters (Conv2d 1x1: weight (COUT, C8, 1, 1) -> (COUT, C8)).
    bound = 1.0 / (C8 ** 0.5)
    weight = jax.random.uniform(k3, (COUT, C8), minval=-bound, maxval=bound,
                                dtype=jnp.float32)
    bias = jax.random.uniform(k4, (COUT,), minval=-bound, maxval=bound,
                              dtype=jnp.float32)

    ref = _reference(feature_stride_8, feature_stride_16, weight, bias)

    # f32 path (faithful to the PyTorch module numerics).
    out = feature_fusion(feature_stride_8, feature_stride_16, weight, bias)
    out = jax.block_until_ready(out)
    assert out.shape == (N, COUT + C16, H2, W2), out.shape
    assert jnp.allclose(out, ref, atol=1e-4, rtol=1e-4), "f32 mismatch vs reference"

    # bf16-feature path (halves HBM traffic on the dominant stride-8 stream; f32 accumulate).
    out_bf16 = feature_fusion(feature_stride_8.astype(jnp.bfloat16),
                              feature_stride_16.astype(jnp.bfloat16),
                              weight, bias)
    out_bf16 = jax.block_until_ready(out_bf16)
    assert out_bf16.dtype == jnp.bfloat16
    assert jnp.allclose(out_bf16.astype(jnp.float32), ref, atol=3e-2, rtol=3e-2), \
        "bf16 mismatch vs reference"

    print("KERNEL_OK")
</pallas_src>

<mosaic_0001>
module attributes {stable_mosaic.version = 11 : i64} {
  func.func @_fusion_kernel(%arg0: i32, %arg1: memref<1x256x256xf32, #tpu.memory_space<vmem>>, %arg2: memref<1x64x64xf32, #tpu.memory_space<vmem>>, %arg3: memref<256x64xf32, #tpu.memory_space<vmem>>, %arg4: memref<64x256xf32, #tpu.memory_space<vmem>>, %arg5: memref<64x1xf32, #tpu.memory_space<vmem>>, %arg6: memref<1x128x64xf32, #tpu.memory_space<vmem>>) attributes {dimension_semantics = [#tpu.dimension_semantics<parallel>], iteration_bounds = array<i64: 2>, scalar_prefetch = 0 : i64, scratch_operands = 0 : i64, tpu.core_type = #tpu.core_type<tc>, window_params = [{transform_indices = @transform_0, window_bounds = array<i64: 1, 256, 256>}, {transform_indices = @transform_1, window_bounds = array<i64: 1, 64, 64>}, {pipeline_mode = #tpu.pipeline_mode<synchronous>, transform_indices = @transform_2, window_bounds = array<i64: 256, 64>}, {pipeline_mode = #tpu.pipeline_mode<synchronous>, transform_indices = @transform_3, window_bounds = array<i64: 64, 256>}, {pipeline_mode = #tpu.pipeline_mode<synchronous>, transform_indices = @transform_4, window_bounds = array<i64: 64, 1>}, {transform_indices = @transform_5, window_bounds = array<i64: 1, 128, 64>}]} {
    %c0 = arith.constant 0 : index
    %c0_0 = arith.constant 0 : index
    %c0_1 = arith.constant 0 : index
    %0 = vector.load %arg1[%c0, %c0_0, %c0_1] : memref<1x256x256xf32, #tpu.memory_space<vmem>>, vector<1x256x256xf32>
    %1 = vector.shape_cast %0 : vector<1x256x256xf32> to vector<256x256xf32>
    %c0_2 = arith.constant 0 : index
    %c0_3 = arith.constant 0 : index
    %2 = vector.load %arg3[%c0_2, %c0_3] : memref<256x64xf32, #tpu.memory_space<vmem>>, vector<256x64xf32>
    %cst = arith.constant dense<0.000000e+00> : vector<256x64xf32>
    %3 = tpu.matmul %1, %2, %cst {dimension_numbers = #tpu.dot_dimension_numbers<[1], [0], [0], [1], [0, 0, 1, 1], [], []>} : vector<256x256xf32>, vector<256x64xf32>, vector<256x64xf32> -> vector<256x64xf32>
    %c0_4 = arith.constant 0 : index
    %c0_5 = arith.constant 0 : index
    %4 = vector.load %arg4[%c0_4, %c0_5] : memref<64x256xf32, #tpu.memory_space<vmem>>, vector<64x256xf32>
    %cst_6 = arith.constant dense<0.000000e+00> : vector<64x64xf32>
    %5 = tpu.matmul %4, %3, %cst_6 {dimension_numbers = #tpu.dot_dimension_numbers<[1], [0], [0], [1], [0, 0, 1, 1], [], []>} : vector<64x256xf32>, vector<256x64xf32>, vector<64x64xf32> -> vector<64x64xf32>
    %c0_7 = arith.constant 0 : index
    %c0_8 = arith.constant 0 : index
    %6 = vector.load %arg5[%c0_7, %c0_8] : memref<64x1xf32, #tpu.memory_space<vmem>>, vector<64x1xf32>
    %7 = vector.broadcast %6 : vector<64x1xf32> to vector<64x64xf32>
    %8 = arith.addf %5, %7 : vector<64x64xf32>
    %c0_9 = arith.constant 0 : index
    %c0_10 = arith.constant 0 : index
    %c0_11 = arith.constant 0 : index
    %9 = vector.load %arg6[%c0_9, %c0_10, %c0_11] : memref<1x128x64xf32, #tpu.memory_space<vmem>>, vector<1x64x64xf32>
    %10 = vector.shape_cast %9 : vector<1x64x64xf32> to vector<64x64xf32>
    %11 = vector.shape_cast %8 : vector<64x64xf32> to vector<1x64x64xf32>
    tpu.vector_store %arg6[%c0_9, %c0_10, %c0_11], %11 {strides = array<i32>} : memref<1x128x64xf32, #tpu.memory_space<vmem>>, vector<1x64x64xf32>,
    %c0_12 = arith.constant 0 : index
    %c0_13 = arith.constant 0 : index
    %c0_14 = arith.constant 0 : index
    %12 = vector.load %arg2[%c0_12, %c0_13, %c0_14] : memref<1x64x64xf32, #tpu.memory_space<vmem>>, vector<1x64x64xf32>
    %13 = vector.shape_cast %12 : vector<1x64x64xf32> to vector<64x64xf32>
    %c0_15 = arith.constant 0 : index
    %c64 = arith.constant 64 : index
    %c0_16 = arith.constant 0 : index
    %14 = vector.load %arg6[%c0_15, %c64, %c0_16] : memref<1x128x64xf32, #tpu.memory_space<vmem>>, vector<1x64x64xf32>
    %15 = vector.shape_cast %14 : vector<1x64x64xf32> to vector<64x64xf32>
    %16 = vector.shape_cast %13 : vector<64x64xf32> to vector<1x64x64xf32>
    tpu.vector_store %arg6[%c0_15, %c64, %c0_16], %16 {strides = array<i32>} : memref<1x128x64xf32, #tpu.memory_space<vmem>>, vector<1x64x64xf32>,
    return
  }
  func.func @transform_0(%arg0: i32) -> (i32, i32, i32) {
    %c0_i32 = arith.constant 0 : i32
    %c0_i32_0 = arith.constant 0 : i32
    %c0_i32_1 = arith.constant 0 : i32
    return %arg0, %c0_i32, %c0_i32_0 : i32, i32, i32
  }
  func.func @transform_1(%arg0: i32) -> (i32, i32, i32) {
    %c0_i32 = arith.constant 0 : i32
    %c0_i32_0 = arith.constant 0 : i32
    %c0_i32_1 = arith.constant 0 : i32
    return %arg0, %c0_i32, %c0_i32_0 : i32, i32, i32
  }
  func.func @transform_2(%arg0: i32) -> (i32, i32) {
    %c0_i32 = arith.constant 0 : i32
    %c0_i32_0 = arith.constant 0 : i32
    %c0_i32_1 = arith.constant 0 : i32
    return %c0_i32, %c0_i32_0 : i32, i32
  }
  func.func @transform_3(%arg0: i32) -> (i32, i32) {
    %c0_i32 = arith.constant 0 : i32
    %c0_i32_0 = arith.constant 0 : i32
    %c0_i32_1 = arith.constant 0 : i32
    return %c0_i32, %c0_i32_0 : i32, i32
  }
  func.func @transform_4(%arg0: i32) -> (i32, i32) {
    %c0_i32 = arith.constant 0 : i32
    %c0_i32_0 = arith.constant 0 : i32
    %c0_i32_1 = arith.constant 0 : i32
    return %c0_i32, %c0_i32_0 : i32, i32
  }
  func.func @transform_5(%arg0: i32) -> (i32, i32, i32) {
    %c0_i32 = arith.constant 0 : i32
    %c0_i32_0 = arith.constant 0 : i32
    %c0_i32_1 = arith.constant 0 : i32
    return %arg0, %c0_i32, %c0_i32_0 : i32, i32, i32
  }
}

</mosaic_0001>

<bundles_post_ra>
// kernel: tpu_custom_call.1
= control target key start
LH: loop header
LB: loop body
LE: loop exit
PB: predicated region body
PF: predicated region fallthrough
CT: control target
= control target key end

     0   :  { %10 = vsyncpa [#allocation3], 0  ;;  %s1649_s0 = inlined_call_operand.hbm [shape: f32[2,256,256], index: 0, kind: input, shape index: {}]   ;;  %s1650_s1 = inlined_call_operand.vmem [shape: f32[2,64,64], index: 1, kind: input, shape index: {}]   ;;  %s1651_s2 = inlined_call_operand.vmem [shape: f32[256,64], index: 2, kind: input, shape index: {}]   ;;  %s1652_s3 = inlined_call_operand.vmem [shape: f32[64,256], index: 3, kind: input, shape index: {}]   ;;  %s1653_s4 = inlined_call_operand.vmem [shape: f32[64,1], index: 4, kind: input, shape index: {}]   ;;  %s1654_s5 = inlined_call_operand.vmem [shape: f32[2,128,64], index: 5, kind: output, shape index: {}]  }
   0x1   :  { %12 = vsyncpa [#allocation3 + $0x1], 0  ;;  %s1190_s18 = smov 0   ;;  %s1192_s19 = smov 0  }
   0x2   :  { %s1194_s20 = smov 0   ;;  %s1196_s21 = smov 0  }
   0x3 LB: > { %s1209_s22 = sadd.s32 4294967295, %s1153_s21   ;;  %s1212_s23 = sadd.s32 1, %s1153_s21   ;;  %s1153_s21 = sphi %s1196_s21, %s1661_s21   ;;  %s1149_s20 = sphi %s1194_s20, %s1660_s20   ;;  %s1145_s19 = sphi %s1192_s19, %s1659_s19   ;;  %s1141_s18 = sphi %s1190_s18, %s1658_s18  }
   0x4   : > { %s22_s24 = ssub.s32 %s1153_s21, %s1212_s23  ;;  %s25_s25 = sadd.s32 1, %s1149_s20 }
   0x5   : > { %p23_p0 = scmp.eq.s32.totalorder %s22_s24, 0  ;;  %p32_p1 = scmp.ne.s32.totalorder %s1149_s20, %s1145_s19 }
   0x6   : > { %p33_p2 = scmp.eq.s32.totalorder %s1153_s21, 0  ;;  %p38_p3 = scmp.ne.s32.totalorder %s1145_s19, %s1141_s18 }
   0x7   : > { %s1222_s26 = scalar_select %p23_p0, %s1149_s20, %s25_s25  }
   0x8   : > { %p34_p4 = por %p33_p2, %p32_p1  ;;  %p39_p5 = scmp.eq.s32.totalorder %s1209_s22, 0 }
   0x9   : > { %p1050_p6 = scmp.lt.s32.totalorder %s1153_s21, 2  ;;  %s186_s28 = sand.u32 1, %s1149_s20  }
   0xa   : > { %p1226_p7 = por %p39_p5, %p38_p3  ;;  %s862_s29 = sshll.u32 %s186_s28, 9 }
   0xb   : > { %s873_s30 = sshll.u32 %s1153_s21, 13  ;;  %s190_s9 = scalar_lea.vmem [#allocation2], %s862_s29 }
   0xc   : > { %s1235_s8 = scalar_lea.hbm %s1649_s0, %s873_s30  ;;  %s197_s10 = sshll.u32 %s190_s9, 4  ;;  %s1237_s10 = int_to_ptr.vmem [resolvable:$true] %s197_s10 }
   0xd   : > { %p1239_p8 = pnand %p1050_p6, %p34_p4  ;;  %s1244_s12 = scalar_lea.sflag [#allocation3], %s186_s28 }
   0xe   : > { %s1089_s13 = scalar_lea.hbm %s1235_s8, 8192  ;;  %s1094_s16 = scalar_lea.hbm %s1649_s0, 16384 }
   0xf   : > { %p1090_p10 = scmp.ne.s32.totalorder %s1235_s8, %s1089_s13  ;;  %p1091_p11 = pneg %p1239_p8 }
  0x10   : > { %p1095_p0 = scmp.lt.u32.totalorder %s1235_s8, %s1649_s0  ;;  %p1096_p1 = scmp.lt.u32.totalorder %s1094_s16, %s1089_s13 }
  0x11   : > { %p1092_p12 = pnand %p1091_p11, %p1090_p10  ;;  %p1098_p3 = scmp.lt.u32.totalorder %s1089_s13, %s1235_s8 }
  0x12   : > { %p1097_p2 = por %p1096_p1, %p1095_p0 }
  0x13   : > { %p1093_p13 = pneg %p1092_p12 }
  0x14   : > { %p1099_p4 = por %p1098_p3, %p1097_p2 }
  0x16   : > { %p1100_p5 = pnand %p1099_p4, %p1093_p13 }
  0x18   : > { %1103 = shalt.err (!%p1100_p5)
}
  0x19   : > { %s1104_s24 = scalar_lea.vmem %s1237_s10, 8192  ;;  %s1155_s25 = smov [#allocation2]  }
  0x1a   : > { %p1105_p6 = scmp.ne.s32.totalorder %s1237_s10, %s1104_s24  ;;  %s1109_s28 = sshll.u32 %s1155_s25, 4  ;;  %s1110_s28 = int_to_ptr.vmem [resolvable:$false] %s1109_s28 }
  0x1b   : > { %s1111_s29 = scalar_lea.vmem %s1110_s28, 16384  ;;  %p1112_p9 = scmp.lt.s32.totalorder %s1237_s10, %s1110_s28 }
  0x1c   : > { %p1107_p10 = pnand %p1105_p6, %p1091_p11  ;;  %p1113_p0 = scmp.lt.s32.totalorder %s1111_s29, %s1104_s24 }
  0x1e   : > { %p1108_p12 = pneg %p1107_p10  ;;  %p1114_p1 = por %p1113_p0, %p1112_p9 }
  0x20   : > { %p1115_p2 = pnand %p1114_p1, %p1108_p12 }
  0x22   : > { %1118 = shalt.err (!%p1115_p2)
}
  0x23   : > { %s1156_s30 = smov 256   ;;  %s1157_s6 = smov 16  }
  0x24   : > { %1049 = dma.hbm_to_vmem [thread:$0]  (!%p1239_p8), %s1235_s8, 8192, %s1237_s10, %s1244_s12, %s1156_s30, %s1156_s30, %s1157_s6  }
  0x25   : > { %p213_p11 = scmp.lt.s32.totalorder %s1153_s21, 3  ;;  %p1657_p13 = scmp.ge.s32.totalorder %s1153_s21, 1 }
  0x27   : > { %p214_p3 = pnand %p1657_p13, %p213_p11 }
  0x28   : > { %s219_s7 = sand.u32 (!%p214_p3), 1, %s1145_s19  }
  0x29   : > { %217 = sbr.rel (%p214_p3) target bundleno = 679 (0x2a7), region = 40  ;;  %s866_s9 = sshll.u32 (!%p214_p3), %s219_s7, 9 }
  0x2a   : > { %s220_s13 = scalar_lea.sflag (!%p214_p3), [#allocation3], %s219_s7  ;;  %s1276_s14 = scalar_lea.vmem (!%p214_p3), [#allocation2], %s866_s9 }
  0x30   : > { %1136 = dma.done.wait (%p1226_p7), %s220_s13, 8192  }
  0x31   : > { %1138 = vsyncadd (%p1226_p7), %s220_s13, 4294959104  ;;  %v1158_v0 = vmov 0.0|0.0   ;;  %v329_v1 = vld [vmem:[%s1651_s2] sm:$0xff]  ;;  %v330_v2 = vld [vmem:[%s1651_s2 + $0x8] sm:$0xff]  ;;  %p255_p7 = scmp.lt.s32.totalorder %s1209_s22, 1  ;;  %vm755_vm0 = vcmask 523264  }
  0x32   : > { %932 = vmatprep.subr.bf16.mxu0 %v1158_v0  ;;  %1012 = vmatprep.subr.bf16.mxu1 %v1158_v0  ;;  %v331_v3 = vld [vmem:[%s1651_s2 + $0x10] sm:$0xff]  ;;  %v933_v4 = vpack.c.bf16 %v330_v2, %v329_v1  ;;  %v332_v5 = vld [vmem:[%s1651_s2 + $0x18] sm:$0xff]  ;;  %v333_v7 = vld [vmem:[%s1651_s2 + $0x20] sm:$0xff] }
  0x33   : > { %v936_v6 = vpack.c.bf16 %v332_v5, %v331_v3  ;;  %v334_v8 = vld [vmem:[%s1651_s2 + $0x28] sm:$0xff]  ;;  %v335_v10 = vld [vmem:[%s1651_s2 + $0x30] sm:$0xff]  ;;  %v336_v11 = vld [vmem:[%s1651_s2 + $0x38] sm:$0xff]  ;;  %s1663_s22 = smov (!%p255_p7, %s1209_s22), 1 }
  0x34   : > { %934 = vmatpush1.bf16.msra.mxu0 %v933_v4  ;;  %1028 = vmatpush1.bf16.msra.mxu1 %v933_v4  ;;  %v939_v9 = vpack.c.bf16 %v334_v8, %v333_v7  ;;  %v266_v12 = vld [vmem:[%s1276_s14 + $0x8] sm:$0xff]  ;;  %v942_v13 = vpack.c.bf16 %v336_v11, %v335_v10  ;;  %v337_v14 = vld [vmem:[%s1651_s2 + $0x40] sm:$0xff]  ;;  %v339_v17 = vld [vmem:[%s1651_s2 + $0x50] sm:$0xff]  ;;  %s874_s30 = sshll.u32 %s1663_s22, 6  ;;  %s875_s6 = sshll.u32 %s1663_s22, 7 }
  0x35   : > { %935 = vmatprep.subr.bf16.mxu0 %v1158_v0  ;;  %1013 = vmatprep.subr.bf16.mxu1 %v1158_v0  ;;  %v338_v15 = vld [vmem:[%s1651_s2 + $0x48] sm:$0xff]  ;;  %v340_v18 = vld [vmem:[%s1651_s2 + $0x58] sm:$0xff]  ;;  %v341_v20 = vld [vmem:[%s1651_s2 + $0x60] sm:$0xff]  ;;  %s259_s13 = scalar_lea.vmem %s1650_s1, %s874_s30  ;;  %s1602_s10 = scalar_lea.vmem %s1654_s5, %s875_s6 }
  0x36   : > { %425 = vmatprep.mubr.f32.mxu0 %v266_v12  ;;  %v945_v16 = vpack.c.bf16 %v338_v15, %v337_v14  ;;  %v948_v19 = vpack.c.bf16 %v340_v18, %v339_v17  ;;  %v342_v21 = vld [vmem:[%s1651_s2 + $0x68] sm:$0xff]  ;;  %v343_v24 = vld [vmem:[%s1651_s2 + $0x70] sm:$0xff]  ;;  %v344_v25 = vld [vmem:[%s1651_s2 + $0x78] sm:$0xff] }
  0x37   : > { %v306_v22 = vld [vmem:[%s1276_s14 + $0x148] sm:$0xff]  ;;  %v951_v23 = vpack.c.bf16 %v342_v21, %v341_v20  ;;  %v954_v26 = vpack.c.bf16 %v344_v25, %v343_v24  ;;  %v345_v27 = vld [vmem:[%s1651_s2 + $0x80] sm:$0xff]  ;;  %v347_v30 = vld [vmem:[%s1651_s2 + $0x90] sm:$0xff] }
  0x38   : > { %937 = vmatpush1.bf16.msra.mxu0 %v936_v6  ;;  %1029 = vmatpush1.bf16.msra.mxu1 %v936_v6  ;;  %v346_v28 = vld [vmem:[%s1651_s2 + $0x88] sm:$0xff]  ;;  %v348_v31 = vld [vmem:[%s1651_s2 + $0x98] sm:$0xff]  ;;  %v349_v33 = vld [vmem:[%s1651_s2 + $0xa0] sm:$0xff] }
  0x39   : > { %938 = vmatprep.subr.bf16.mxu0 %v1158_v0  ;;  %1014 = vmatprep.subr.bf16.mxu1 %v1158_v0  ;;  %v957_v29 = vpack.c.bf16 %v346_v28, %v345_v27  ;;  %v960_v32 = vpack.c.bf16 %v348_v31, %v347_v30  ;;  %v350_v34 = vld [vmem:[%s1651_s2 + $0xa8] sm:$0xff]  ;;  %v351_v36 = vld [vmem:[%s1651_s2 + $0xb0] sm:$0xff]  ;;  %v352_v37 = vld [vmem:[%s1651_s2 + $0xb8] sm:$0xff] }
  0x3a   : > { %525 = vmatprep.mubr.f32.mxu1 %v306_v22  ;;  %v963_v35 = vpack.c.bf16 %v350_v34, %v349_v33  ;;  %v966_v38 = vpack.c.bf16 %v352_v37, %v351_v36  ;;  %v353_v39 = vld [vmem:[%s1651_s2 + $0xc0] sm:$0xff]  ;;  %v354_v40 = vld [vmem:[%s1651_s2 + $0xc8] sm:$0xff]  ;;  %v355_v42 = vld [vmem:[%s1651_s2 + $0xd0] sm:$0xff] }
  0x3b   : > { %v969_v41 = vpack.c.bf16 %v354_v40, %v353_v39  ;;  %v356_v43 = vld [vmem:[%s1651_s2 + $0xd8] sm:$0xff]  ;;  %v357_v45 = vld [vmem:[%s1651_s2 + $0xe0] sm:$0xff]  ;;  %v358_v46 = vld [vmem:[%s1651_s2 + $0xe8] sm:$0xff] }
  0x3c   : > { %940 = vmatpush1.bf16.msra.mxu0 %v939_v9  ;;  %1030 = vmatpush1.bf16.msra.mxu1 %v939_v9  ;;  %v972_v44 = vpack.c.bf16 %v356_v43, %v355_v42  ;;  %v975_v47 = vpack.c.bf16 %v358_v46, %v357_v45  ;;  %v359_v48 = vld [vmem:[%s1651_s2 + $0xf0] sm:$0xff]  ;;  %v360_v49 = vld [vmem:[%s1651_s2 + $0xf8] sm:$0xff]  ;;  %v265_v51 = vld [vmem:[%s1276_s14] sm:$0xff] }
  0x3d   : > { %941 = vmatprep.subr.bf16.mxu0 %v1158_v0  ;;  %1015 = vmatprep.subr.bf16.mxu1 %v1158_v0  ;;  %v978_v50 = vpack.c.bf16 %v360_v49, %v359_v48  ;;  %v268_v52 = vld [vmem:[%s1276_s14 + $0x18] sm:$0xff]  ;;  %v305_v53 = vld [vmem:[%s1276_s14 + $0x140] sm:$0xff]  ;;  %v267_v55 = vld [vmem:[%s1276_s14 + $0x10] sm:$0xff] }
  0x3e   : > { %v308_v54 = vld [vmem:[%s1276_s14 + $0x158] sm:$0xff]  ;;  %v270_v56 = vld [vmem:[%s1276_s14 + $0x28] sm:$0xff]  ;;  %v307_v57 = vld [vmem:[%s1276_s14 + $0x150] sm:$0xff] }
  0x3f   : > { %v310_v58 = vld [vmem:[%s1276_s14 + $0x168] sm:$0xff]  ;;  %v269_v59 = vld [vmem:[%s1276_s14 + $0x20] sm:$0xff]  ;;  %v272_v60 = vld [vmem:[%s1276_s14 + $0x38] sm:$0xff] }
  0x40   : > { %943 = vmatpush1.bf16.msra.mxu0 %v942_v13  ;;  %1031 = vmatpush1.bf16.msra.mxu1 %v942_v13  ;;  %v309_v61 = vld [vmem:[%s1276_s14 + $0x160] sm:$0xff]  ;;  %v312_v62 = vld [vmem:[%s1276_s14 + $0x178] sm:$0xff]  ;;  %v271_v63 = vld [vmem:[%s1276_s14 + $0x30] sm:$0xff] }
  0x41   : > { %944 = vmatprep.subr.bf16.mxu0 %v1158_v0  ;;  %1016 = vmatprep.subr.bf16.mxu1 %v1158_v0  ;;  %v311_v1 = vld [vmem:[%s1276_s14 + $0x170] sm:$0xff]  ;;  %v314_v2 = vld [vmem:[%s1276_s14 + $0x188] sm:$0xff]  ;;  %v273_v3 = vld [vmem:[%s1276_s14 + $0x40] sm:$0xff] }
  0x42   : > { %v276_v4 = vld [vmem:[%s1276_s14 + $0x58] sm:$0xff]  ;;  %v313_v5 = vld [vmem:[%s1276_s14 + $0x180] sm:$0xff]  ;;  %v275_v7 = vld [vmem:[%s1276_s14 + $0x50] sm:$0xff] }
  0x43   : > { %v316_v6 = vld [vmem:[%s1276_s14 + $0x198] sm:$0xff]  ;;  %v278_v8 = vld [vmem:[%s1276_s14 + $0x68] sm:$0xff]  ;;  %v315_v9 = vld [vmem:[%s1276_s14 + $0x190] sm:$0xff] }
  0x44   : > { %946 = vmatpush1.bf16.msra.mxu0 %v945_v16  ;;  %1032 = vmatpush1.bf16.msra.mxu1 %v945_v16  ;;  %v318_v10 = vld [vmem:[%s1276_s14 + $0x1a8] sm:$0xff]  ;;  %v277_v11 = vld [vmem:[%s1276_s14 + $0x60] sm:$0xff]  ;;  %v280_v12 = vld [vmem:[%s1276_s14 + $0x78] sm:$0xff] }
  0x45   : > { %947 = vmatprep.subr.bf16.mxu0 %v1158_v0  ;;  %1017 = vmatprep.subr.bf16.mxu1 %v1158_v0  ;;  %v317_v13 = vld [vmem:[%s1276_s14 + $0x1a0] sm:$0xff]  ;;  %v320_v14 = vld [vmem:[%s1276_s14 + $0x1b8] sm:$0xff]  ;;  %v279_v15 = vld [vmem:[%s1276_s14 + $0x70] sm:$0xff] }
  0x46   : > { %v282_v16 = vld [vmem:[%s1276_s14 + $0x88] sm:$0xff]  ;;  %v319_v17 = vld [vmem:[%s1276_s14 + $0x1b0] sm:$0xff]  ;;  %v284_v20 = vld [vmem:[%s1276_s14 + $0x98] sm:$0xff] }
  0x47   : > { %v322_v18 = vld [vmem:[%s1276_s14 + $0x1c8] sm:$0xff]  ;;  %v321_v21 = vld [vmem:[%s1276_s14 + $0x1c0] sm:$0xff]  ;;  %v324_v22 = vld [vmem:[%s1276_s14 + $0x1d8] sm:$0xff] }
  0x48   : > { %949 = vmatpush1.bf16.msra.mxu0 %v948_v19  ;;  %1033 = vmatpush1.bf16.msra.mxu1 %v948_v19  ;;  %v281_v19 = vld [vmem:[%s1276_s14 + $0x80] sm:$0xff]  ;;  %v286_v24 = vld [vmem:[%s1276_s14 + $0xa8] sm:$0xff]  ;;  %v323_v25 = vld [vmem:[%s1276_s14 + $0x1d0] sm:$0xff] }
  0x49   : > { %950 = vmatprep.subr.bf16.mxu0 %v1158_v0  ;;  %1018 = vmatprep.subr.bf16.mxu1 %v1158_v0  ;;  %v285_v27 = vld [vmem:[%s1276_s14 + $0xa0] sm:$0xff]  ;;  %v288_v28 = vld [vmem:[%s1276_s14 + $0xb8] sm:$0xff]  ;;  %v287_v31 = vld [vmem:[%s1276_s14 + $0xb0] sm:$0xff] }
  0x4a   : > { %v328_v30 = vld [vmem:[%s1276_s14 + $0x1f8] sm:$0xff]  ;;  %v327_v33 = vld [vmem:[%s1276_s14 + $0x1f0] sm:$0xff]  ;;  %v289_v34 = vld [vmem:[%s1276_s14 + $0xc0] sm:$0xff] }
  0x4b   : > { %v291_v36 = vld [vmem:[%s1276_s14 + $0xd0] sm:$0xff]  ;;  %v294_v37 = vld [vmem:[%s1276_s14 + $0xe8] sm:$0xff]  ;;  %v296_v39 = vld [vmem:[%s1276_s14 + $0xf8] sm:$0xff] }
  0x4c   : > { %952 = vmatpush1.bf16.msra.mxu0 %v951_v23  ;;  %1034 = vmatpush1.bf16.msra.mxu1 %v951_v23  ;;  %v283_v23 = vld [vmem:[%s1276_s14 + $0x90] sm:$0xff]  ;;  %v297_v42 = vld [vmem:[%s1276_s14 + $0x100] sm:$0xff]  ;;  %v300_v43 = vld [vmem:[%s1276_s14 + $0x118] sm:$0xff] }
  0x4d   : > { %953 = vmatprep.subr.bf16.mxu0 %v1158_v0  ;;  %1019 = vmatprep.subr.bf16.mxu1 %v1158_v0  ;;  %v295_v40 = vld [vmem:[%s1276_s14 + $0xf0] sm:$0xff]  ;;  %v302_v45 = vld [vmem:[%s1276_s14 + $0x128] sm:$0xff]  ;;  %v301_v46 = vld [vmem:[%s1276_s14 + $0x120] sm:$0xff] }
  0x4e   : > { %v303_v48 = vld [vmem:[%s1276_s14 + $0x130] sm:$0xff]  ;;  %v587_v49 = vld [vmem:[%s1652_s3 + $0x8] sm:$0xff] }
  0x50   : > { %955 = vmatpush1.bf16.msra.mxu0 %v954_v26  ;;  %1035 = vmatpush1.bf16.msra.mxu1 %v954_v26  ;;  %v326_v26 = vld [vmem:[%s1276_s14 + $0x1e8] sm:$0xff] }
  0x51   : > { %956 = vmatprep.subr.bf16.mxu0 %v1158_v0  ;;  %1020 = vmatprep.subr.bf16.mxu1 %v1158_v0 }
  0x54   : > { %958 = vmatpush1.bf16.msra.mxu0 %v957_v29  ;;  %1036 = vmatpush1.bf16.msra.mxu1 %v957_v29  ;;  %v325_v29 = vld [vmem:[%s1276_s14 + $0x1e0] sm:$0xff] }
  0x55   : > { %959 = vmatprep.subr.bf16.mxu0 %v1158_v0  ;;  %1021 = vmatprep.subr.bf16.mxu1 %v1158_v0 }
  0x58   : > { %961 = vmatpush1.bf16.msra.mxu0 %v960_v32  ;;  %1037 = vmatpush1.bf16.msra.mxu1 %v960_v32  ;;  %v290_v32 = vld [vmem:[%s1276_s14 + $0xc8] sm:$0xff] }
  0x59   : > { %962 = vmatprep.subr.bf16.mxu0 %v1158_v0  ;;  %1022 = vmatprep.subr.bf16.mxu1 %v1158_v0 }
  0x5c   : > { %964 = vmatpush1.bf16.msra.mxu0 %v963_v35  ;;  %1038 = vmatpush1.bf16.msra.mxu1 %v963_v35  ;;  %v292_v35 = vld [vmem:[%s1276_s14 + $0xd8] sm:$0xff] }
  0x5d   : > { %965 = vmatprep.subr.bf16.mxu0 %v1158_v0  ;;  %1023 = vmatprep.subr.bf16.mxu1 %v1158_v0 }
  0x60   : > { %967 = vmatpush1.bf16.msra.mxu0 %v966_v38  ;;  %1039 = vmatpush1.bf16.msra.mxu1 %v966_v38  ;;  %v293_v38 = vld [vmem:[%s1276_s14 + $0xe0] sm:$0xff] }
  0x61   : > { %968 = vmatprep.subr.bf16.mxu0 %v1158_v0  ;;  %1024 = vmatprep.subr.bf16.mxu1 %v1158_v0 }
  0x64   : > { %970 = vmatpush1.bf16.msra.mxu0 %v969_v41  ;;  %1040 = vmatpush1.bf16.msra.mxu1 %v969_v41  ;;  %v298_v41 = vld [vmem:[%s1276_s14 + $0x108] sm:$0xff] }
  0x65   : > { %971 = vmatprep.subr.bf16.mxu0 %v1158_v0  ;;  %1025 = vmatprep.subr.bf16.mxu1 %v1158_v0 }
  0x68   : > { %973 = vmatpush1.bf16.msra.mxu0 %v972_v44  ;;  %1041 = vmatpush1.bf16.msra.mxu1 %v972_v44  ;;  %v299_v44 = vld [vmem:[%s1276_s14 + $0x110] sm:$0xff] }
  0x69   : > { %974 = vmatprep.subr.bf16.mxu0 %v1158_v0  ;;  %1026 = vmatprep.subr.bf16.mxu1 %v1158_v0 }
  0x6c   : > { %976 = vmatpush1.bf16.msra.mxu0 %v975_v47  ;;  %1042 = vmatpush1.bf16.msra.mxu1 %v975_v47  ;;  %v304_v47 = vld [vmem:[%s1276_s14 + $0x138] sm:$0xff] }
  0x6d   : > { %977 = vmatprep.subr.bf16.mxu0 %v1158_v0  ;;  %1027 = vmatprep.subr.bf16.mxu1 %v1158_v0  ;;  %v274_v0 = vld [vmem:[%s1276_s14 + $0x48] sm:$0xff] }
  0x70   : > { %979 = vmatpush1.bf16.msra.mxu0 %v978_v50  ;;  %1043 = vmatpush1.bf16.msra.mxu1 %v978_v50 }
  0x73   : > { %426 = vmatmul.mubr.f32.vlgmr.msra.gmra.mrb[0].mxu0 %v265_v51  ;;  %526 = vmatmul.mubr.f32.vlgmr.msra.gmra.mrb[0].mxu1 %v305_v53 }
  0x74   : > { %430 = vmatprep.mubr.f32.mxu0 %v268_v52  ;;  %530 = vmatprep.mubr.f32.mxu1 %v308_v54 }
  0x77   : > { %431 = vmatmul.mubr.f32.gmra.mrb[2].mxu0 %v267_v55  ;;  %531 = vmatmul.mubr.f32.gmra.mrb[2].mxu1 %v307_v57 }
  0x78   : > { %435 = vmatprep.mubr.f32.mxu0 %v270_v56  ;;  %535 = vmatprep.mubr.f32.mxu1 %v310_v58 }
  0x7b   : > { %436 = vmatmul.mubr.f32.gmra.mrb[4].mxu0 %v269_v59  ;;  %536 = vmatmul.mubr.f32.gmra.mrb[4].mxu1 %v309_v61  ;;  %v604_v61 = vld [vmem:[%s1653_s4 + $0x10] sm:$0xff] }
  0x7c   : > { %440 = vmatprep.mubr.f32.mxu0 %v272_v60  ;;  %540 = vmatprep.mubr.f32.mxu1 %v312_v62  ;;  %v602_v60 = vld [vmem:[%s1653_s4] sm:$0xff] }
  0x7f   : > { %441 = vmatmul.mubr.f32.gmra.mrb[6].mxu0 %v271_v63  ;;  %541 = vmatmul.mubr.f32.gmra.mrb[6].mxu1 %v311_v1  ;;  %v1159_v63 = vmov 0  }
  0x80   : > { %445 = vmatprep.mubr.f32.mxu0 %v274_v0  ;;  %545 = vmatprep.mubr.f32.mxu1 %v314_v2 }
  0x81   : > { %1087 = vset.pattern.permute.xlu0 %v1159_v63  ;;  %1088 = vset.pattern.permute.xlu1 %v1159_v63 }
  0x82   : > { %612 = vperm.xlu0 %1087, %v602_v60   ;;  %622 = vperm.xlu1 %1088, %v604_v61  }
  0x83   : > { %446 = vmatmul.mubr.f32.gmra.mrb[8].mxu0 %v273_v3  ;;  %546 = vmatmul.mubr.f32.gmra.mrb[8].mxu1 %v313_v5  ;;  %v603_v3 = vld [vmem:[%s1653_s4 + $0x8] sm:$0xff] }
  0x84   : > { %450 = vmatprep.mubr.f32.mxu0 %v276_v4  ;;  %550 = vmatprep.mubr.f32.mxu1 %v316_v6  ;;  %v605_v4 = vld [vmem:[%s1653_s4 + $0x18] sm:$0xff] }
  0x86   : > { %617 = vperm.xlu0 %1087, %v603_v3   ;;  %627 = vperm.xlu1 %1088, %v605_v4  }
  0x87   : > { %451 = vmatmul.mubr.f32.gmra.mrb[10].mxu0 %v275_v7  ;;  %551 = vmatmul.mubr.f32.gmra.mrb[10].mxu1 %v315_v9 }
  0x88   : > { %455 = vmatprep.mubr.f32.mxu0 %v278_v8  ;;  %555 = vmatprep.mubr.f32.mxu1 %v318_v10 }
  0x8b   : > { %456 = vmatmul.mubr.f32.gmra.mrb[12].mxu0 %v277_v11  ;;  %556 = vmatmul.mubr.f32.gmra.mrb[12].mxu1 %v317_v13  ;;  %v607_v11 = vld [vmem:[%s1653_s4 + $0x28] sm:$0xff] }
  0x8c   : > { %460 = vmatprep.mubr.f32.mxu0 %v280_v12  ;;  %560 = vmatprep.mubr.f32.mxu1 %v320_v14  ;;  %v606_v12 = vld [vmem:[%s1653_s4 + $0x20] sm:$0xff] }
  0x8d   : > { %637 = vperm.xlu1 %1088, %v607_v11   ;;  %632 = vperm.xlu0 %1087, %v606_v12  }
  0x8f   : > { %461 = vmatmul.mubr.f32.gmra.mrb[14].mxu0 %v279_v15  ;;  %561 = vmatmul.mubr.f32.gmra.mrb[14].mxu1 %v319_v17  ;;  %v609_v17 = vld [vmem:[%s1653_s4 + $0x38] sm:$0xff] }
  0x90   : > { %465 = vmatprep.mubr.f32.mxu0 %v282_v16  ;;  %565 = vmatprep.mubr.f32.mxu1 %v322_v18  ;;  %v608_v18 = vld [vmem:[%s1653_s4 + $0x30] sm:$0xff] }
  0x91   : > { %647 = vperm.xlu1 %1088, %v609_v17   ;;  %642 = vperm.xlu0 %1087, %v608_v18  }
  0x93   : > { %466 = vmatmul.mubr.f32.gmra.mrb[16].mxu0 %v281_v19  ;;  %566 = vmatmul.mubr.f32.gmra.mrb[16].mxu1 %v321_v21 }
  0x94   : > { %470 = vmatprep.mubr.f32.mxu0 %v284_v20  ;;  %570 = vmatprep.mubr.f32.mxu1 %v324_v22 }
  0x97   : > { %471 = vmatmul.mubr.f32.gmra.mrb[18].mxu0 %v283_v23  ;;  %571 = vmatmul.mubr.f32.gmra.mrb[18].mxu1 %v323_v25 }
  0x98   : > { %475 = vmatprep.mubr.f32.mxu0 %v286_v24  ;;  %575 = vmatprep.mubr.f32.mxu1 %v326_v26 }
  0x9b   : > { %476 = vmatmul.mubr.f32.gmra.mrb[20].mxu0 %v285_v27  ;;  %576 = vmatmul.mubr.f32.gmra.mrb[20].mxu1 %v325_v29 }
  0x9c   : > { %480 = vmatprep.mubr.f32.mxu0 %v288_v28  ;;  %580 = vmatprep.mubr.f32.mxu1 %v328_v30 }
  0x9f   : > { %481 = vmatmul.mubr.f32.gmra.mrb[22].mxu0 %v287_v31  ;;  %581 = vmatmul.mubr.f32.gmra.mrb[22].mxu1 %v327_v33 }
  0xa0   : > { %485 = vmatprep.mubr.f32.mxu0 %v290_v32  ;;  %714 = vmatprep.mubr.f32.mxu1 %v587_v49 }
  0xa3   : > { %486 = vmatmul.mubr.f32.gmra.mrb[24].mxu0 %v289_v34 }
  0xa4   : > { %490 = vmatprep.mubr.f32.mxu0 %v292_v35 }
  0xa7   : > { %491 = vmatmul.mubr.f32.gmra.mrb[26].mxu0 %v291_v36 }
  0xa8   : > { %495 = vmatprep.mubr.f32.mxu0 %v294_v37 }
  0xab   : > { %496 = vmatmul.mubr.f32.gmra.mrb[28].mxu0 %v293_v38 }
  0xac   : > { %500 = vmatprep.mubr.f32.mxu0 %v296_v39 }
  0xaf   : > { %501 = vmatmul.mubr.f32.gmra.mrb[30].mxu0 %v295_v40 }
  0xb0   : > { %505 = vmatprep.mubr.f32.mxu0 %v298_v41 }
  0xb3   : > { %506 = vmatmul.mubr.f32.gmra.mrb[32].mxu0 %v297_v42 }
  0xb4   : > { %510 = vmatprep.mubr.f32.mxu0 %v300_v43 }
  0xb7   : > { %511 = vmatmul.mubr.f32.gmra.mrb[34].mxu0 %v299_v44 }
  0xb8   : > { %515 = vmatprep.mubr.f32.mxu0 %v302_v45 }
  0xbb   : > { %516 = vmatmul.mubr.f32.gmra.mrb[36].mxu0 %v301_v46 }
  0xbc   : > { %520 = vmatprep.mubr.f32.mxu0 %v304_v47 }
  0xbf   : > { %521 = vmatmul.mubr.f32.gmra.mrb[38].mxu0 %v303_v48 }
 0x146   : > { %v1477_v50 = vpop.f32.mrb[0].mxu0  ;;  %v1479_v52 = vpop.f32.mrb[0].mxu1 }
 0x147   : > { %v429_v51 = vpop.f32.mrb[1].mxu0  ;;  %v529_v53 = vpop.f32.mrb[1].mxu1 }
 0x14a   : > { %v1481_v54 = vpop.f32.mrb[2].mxu0  ;;  %v1485_v57 = vpop.f32.mrb[2].mxu1 }
 0x14b   : > { %v982_v55 = vpack.c.bf16 %v1481_v54, %v1477_v50  ;;  %v434_v56 = vpop.f32.mrb[3].mxu0  ;;  %v988_v58 = vpack.c.bf16 %v1485_v57, %v1479_v52  ;;  %v534_v59 = vpop.f32.mrb[3].mxu1  ;;  %v586_v50 = vld [vmem:[%s1652_s3] sm:$0xff]  ;;  %v589_v52 = vld [vmem:[%s1652_s3 + $0x18] sm:$0xff]  ;;  %v588_v54 = vld [vmem:[%s1652_s3 + $0x10] sm:$0xff] }
 0x14c   : > { %v590_v57 = vld [vmem:[%s1652_s3 + $0x20] sm:$0xff] }
 0x14e   : > { %v1495_v62 = vpop.f32.mrb[4].mxu0  ;;  %v1497_v1 = vpop.f32.mrb[4].mxu1 }
 0x14f   : > { %v439_v0 = vpop.f32.mrb[5].mxu0  ;;  %v539_v2 = vpop.f32.mrb[5].mxu1 }
 0x152   : > { %v1505_v5 = vpop.f32.mrb[6].mxu0  ;;  %v1509_v8 = vpop.f32.mrb[6].mxu1 }
 0x153   : > { %v986_v6 = vpack.c.bf16 %v1505_v5, %v1495_v62  ;;  %v444_v7 = vpop.f32.mrb[7].mxu0  ;;  %v992_v9 = vpack.c.bf16 %v1509_v8, %v1497_v1  ;;  %v544_v10 = vpop.f32.mrb[7].mxu1  ;;  %v592_v62 = vld [vmem:[%s1652_s3 + $0x30] sm:$0xff]  ;;  %v595_v1 = vld [vmem:[%s1652_s3 + $0x48] sm:$0xff]  ;;  %v594_v5 = vld [vmem:[%s1652_s3 + $0x40] sm:$0xff] }
 0x154   : > { %v596_v8 = vld [vmem:[%s1652_s3 + $0x50] sm:$0xff] }
 0x156   : > { %v1519_v13 = vpop.f32.mrb[8].mxu0  ;;  %v1521_v15 = vpop.f32.mrb[8].mxu1 }
 0x157   : > { %v449_v14 = vpop.f32.mrb[9].mxu0  ;;  %v549_v16 = vpop.f32.mrb[9].mxu1 }
 0x15a   : > { %v1529_v19 = vpop.f32.mrb[10].mxu0  ;;  %v1533_v22 = vpop.f32.mrb[10].mxu1 }
 0x15b   : > { %v990_v20 = vpack.c.bf16 %v1529_v19, %v1519_v13  ;;  %v454_v21 = vpop.f32.mrb[11].mxu0  ;;  %v996_v23 = vpack.c.bf16 %v1533_v22, %v1521_v15  ;;  %v554_v24 = vpop.f32.mrb[11].mxu1 }
 0x15e   : > { %v457_v25 = vpop.f32.mrb[12].mxu0  ;;  %v557_v27 = vpop.f32.mrb[12].mxu1 }
 0x15f   : > { %v459_v26 = vpop.f32.mrb[13].mxu0  ;;  %v559_v28 = vpop.f32.mrb[13].mxu1 }
 0x160   : > { %v764_v26 = vld [vmem:[%s259_s13] sm:$0xff]  ;;  %v766_v28 = vld [vmem:[%s259_s13 + $0x10] sm:$0xff] }
 0x161   : > { %772 = vst.msk [vmem:[%s1602_s10 + $0x40] sm:$0xff] %vm755_vm0, %v764_v26  ;;  %774 = vst.msk [vmem:[%s1602_s10 + $0x50] sm:$0xff] %vm755_vm0, %v766_v28 }
 0x162   : > { %v462_v29 = vpop.f32.mrb[14].mxu0  ;;  %v562_v32 = vpop.f32.mrb[14].mxu1 }
 0x163   : > { %v994_v30 = vpack.c.bf16 %v462_v29, %v457_v25  ;;  %v464_v31 = vpop.f32.mrb[15].mxu0  ;;  %v1000_v33 = vpack.c.bf16 %v562_v32, %v557_v27  ;;  %v564_v34 = vpop.f32.mrb[15].mxu1  ;;  %v600_v25 = vld [vmem:[%s1652_s3 + $0x70] sm:$0xff]  ;;  %v765_v27 = vld [vmem:[%s259_s13 + $0x8] sm:$0xff]  ;;  %v767_v29 = vld [vmem:[%s259_s13 + $0x18] sm:$0xff] }
 0x164   : > { %v769_v31 = vld [vmem:[%s259_s13 + $0x28] sm:$0xff]  ;;  %773 = vst.msk [vmem:[%s1602_s10 + $0x48] sm:$0xff] %vm755_vm0, %v765_v27  ;;  %v770_v32 = vld [vmem:[%s259_s13 + $0x30] sm:$0xff]  ;;  %775 = vst.msk [vmem:[%s1602_s10 + $0x58] sm:$0xff] %vm755_vm0, %v767_v29  ;;  %v613_v34 = vpop.permute.xlu0 %612 }
 0x165   : > { %777 = vst.msk [vmem:[%s1602_s10 + $0x68] sm:$0xff] %vm755_vm0, %v769_v31  ;;  %778 = vst.msk [vmem:[%s1602_s10 + $0x70] sm:$0xff] %vm755_vm0, %v770_v32 }
 0x166   : > { %v467_v35 = vpop.f32.mrb[16].mxu0  ;;  %v567_v37 = vpop.f32.mrb[16].mxu1 }
 0x167   : > { %v469_v36 = vpop.f32.mrb[17].mxu0  ;;  %v569_v38 = vpop.f32.mrb[17].mxu1 }
 0x16a   : > { %v472_v39 = vpop.f32.mrb[18].mxu0  ;;  %v572_v42 = vpop.f32.mrb[18].mxu1 }
 0x16b   : > { %v998_v40 = vpack.c.bf16 %v472_v39, %v467_v35  ;;  %v474_v41 = vpop.f32.mrb[19].mxu0  ;;  %v1004_v43 = vpack.c.bf16 %v572_v42, %v567_v37  ;;  %v574_v44 = vpop.f32.mrb[19].mxu1 }
 0x16c   : > { %v618_v41 = vpop.permute.xlu0 %617 }
 0x16e   : > { %v477_v45 = vpop.f32.mrb[20].mxu0  ;;  %v577_v47 = vpop.f32.mrb[20].mxu1 }
 0x16f   : > { %v479_v46 = vpop.f32.mrb[21].mxu0  ;;  %v579_v48 = vpop.f32.mrb[21].mxu1 }
 0x172   : > { %v482_v49 = vpop.f32.mrb[22].mxu0  ;;  %v582_v56 = vpop.f32.mrb[22].mxu1 }
 0x173   : > { %v1002_v51 = vpack.c.bf16 %v482_v49, %v477_v45  ;;  %v484_v53 = vpop.f32.mrb[23].mxu0  ;;  %v1008_v59 = vpack.c.bf16 %v582_v56, %v577_v47  ;;  %v584_v60 = vpop.f32.mrb[23].mxu1 }
 0x174   : > { %v623_v45 = vpop.permute.xlu1 %622 }
 0x176   : > { %v487_v61 = vpop.f32.mrb[24].mxu0 }
 0x177   : > { %v489_v63 = vpop.f32.mrb[25].mxu0 }
 0x178   : > { %v628_v56 = vpop.permute.xlu1 %627 }
 0x17a   : > { %v492_v0 = vpop.f32.mrb[26].mxu0 }
 0x17b   : > { %v1006_v2 = vpack.c.bf16 %v492_v0, %v487_v61  ;;  %v494_v3 = vpop.f32.mrb[27].mxu0  ;;  %v633_v0 = vpop.permute.xlu0 %632 }
 0x17e   : > { %v497_v4 = vpop.f32.mrb[28].mxu0 }
 0x17f   : > { %v499_v7 = vpop.f32.mrb[29].mxu0 }
 0x182   : > { %v502_v10 = vpop.f32.mrb[30].mxu0 }
 0x183   : > { %v1010_v11 = vpack.c.bf16 %v502_v10, %v497_v4  ;;  %v504_v12 = vpop.f32.mrb[31].mxu0  ;;  %v638_v10 = vpop.permute.xlu1 %637 }
 0x186   : > { %v507_v13 = vpop.f32.mrb[32].mxu0 }
 0x187   : > { %v509_v14 = vpop.f32.mrb[33].mxu0 }
 0x18a   : > { %v512_v15 = vpop.f32.mrb[34].mxu0 }
 0x18b   : > { %v980_v16 = vpack.c.bf16 %v512_v15, %v507_v13  ;;  %v514_v17 = vpop.f32.mrb[35].mxu0  ;;  %v643_v15 = vpop.permute.xlu0 %642 }
 0x18d   : > { %981 = vmatprep.subr.bf16.mxu1 %v980_v16 }
 0x18e   : > { %v517_v18 = vpop.f32.mrb[36].mxu0  ;;  %983 = vmatpush3.bf16.msra.mxu1 %v982_v55  ;;  %v591_v55 = vld [vmem:[%s1652_s3 + $0x28] sm:$0xff] }
 0x18f   : > { %v519_v19 = vpop.f32.mrb[37].mxu0 }
 0x192   : > { %v522_v21 = vpop.f32.mrb[38].mxu0 }
 0x193   : > { %v984_v22 = vpack.c.bf16 %v522_v21, %v517_v18  ;;  %v524_v24 = vpop.f32.mrb[39].mxu0  ;;  %v648_v21 = vpop.permute.xlu1 %647 }
 0x195   : > { %985 = vmatprep.subr.bf16.mxu1 %v984_v22 }
 0x196   : > { %987 = vmatpush3.bf16.msra.mxu1 %v986_v6  ;;  %v597_v6 = vld [vmem:[%s1652_s3 + $0x58] sm:$0xff] }
 0x197   : > { %989 = vmatprep.subr.bf16.mxu1 %v988_v58  ;;  %v593_v58 = vld [vmem:[%s1652_s3 + $0x38] sm:$0xff] }
 0x19a   : > { %991 = vmatpush3.bf16.msra.mxu1 %v990_v20  ;;  %v598_v20 = vld [vmem:[%s1652_s3 + $0x60] sm:$0xff] }
 0x19b   : > { %993 = vmatprep.subr.bf16.mxu1 %v992_v9  ;;  %v599_v9 = vld [vmem:[%s1652_s3 + $0x68] sm:$0xff] }
 0x19e   : > { %995 = vmatpush3.bf16.msra.mxu1 %v994_v30  ;;  %v768_v30 = vld [vmem:[%s259_s13 + $0x20] sm:$0xff] }
 0x19f   : > { %997 = vmatprep.subr.bf16.mxu1 %v996_v23  ;;  %v601_v23 = vld [vmem:[%s1652_s3 + $0x78] sm:$0xff]  ;;  %776 = vst.msk [vmem:[%s1602_s10 + $0x60] sm:$0xff] %vm755_vm0, %v768_v30 }
 0x1a2   : > { %999 = vmatpush3.bf16.msra.mxu1 %v998_v40 }
 0x1a3   : > { %1001 = vmatprep.subr.bf16.mxu1 %v1000_v33  ;;  %v771_v33 = vld [vmem:[%s259_s13 + $0x38] sm:$0xff] }
 0x1a4   : > { %779 = vst.msk [vmem:[%s1602_s10 + $0x78] sm:$0xff] %vm755_vm0, %v771_v33 }
 0x1a6   : > { %1003 = vmatpush3.bf16.msra.mxu1 %v1002_v51 }
 0x1a7   : > { %1005 = vmatprep.subr.bf16.mxu1 %v1004_v43 }
 0x1aa   : > { %1007 = vmatpush3.bf16.msra.mxu1 %v1006_v2 }
 0x1ab   : > { %1009 = vmatprep.subr.bf16.mxu1 %v1008_v59 }
 0x1ae   : > { %1011 = vmatpush3.bf16.msra.mxu1 %v1010_v11 }
 0x1b1   : > { %715 = vmatmul.mubr.f32.vlgmr.msra.gmra.mrb[24].mxu1 %v586_v50 }
 0x1b2   : > { %719 = vmatprep.mubr.f32.mxu1 %v589_v52 }
 0x1b5   : > { %720 = vmatmul.mubr.f32.gmra.mrb[26].mxu1 %v588_v54 }
 0x1b6   : > { %724 = vmatprep.mubr.f32.mxu1 %v591_v55 }
 0x1b9   : > { %725 = vmatmul.mubr.f32.gmra.mrb[28].mxu1 %v590_v57 }
 0x1ba   : > { %729 = vmatprep.mubr.f32.mxu1 %v593_v58 }
 0x1bd   : > { %730 = vmatmul.mubr.f32.gmra.mrb[30].mxu1 %v592_v62 }
 0x1be   : > { %734 = vmatprep.mubr.f32.mxu1 %v595_v1 }
 0x1c1   : > { %735 = vmatmul.mubr.f32.gmra.mrb[32].mxu1 %v594_v5 }
 0x1c2   : > { %739 = vmatprep.mubr.f32.mxu1 %v597_v6 }
 0x1c5   : > { %740 = vmatmul.mubr.f32.gmra.mrb[34].mxu1 %v596_v8 }
 0x1c6   : > { %744 = vmatprep.mubr.f32.mxu1 %v599_v9 }
 0x1c9   : > { %745 = vmatmul.mubr.f32.gmra.mrb[36].mxu1 %v598_v20 }
 0x1ca   : > { %749 = vmatprep.mubr.f32.mxu1 %v601_v23 }
 0x1cd   : > { %750 = vmatmul.mubr.f32.gmra.mrb[38].mxu1 %v600_v25 }
 0x284   : > { %v908_v35 = vpop.f32.mrb[24].mxu1 }
 0x285   : > { %v909_v36 = vpop.f32.mrb[25].mxu1 }
 0x286   : > { %v910_v37 = vadd.f32 %v909_v36, %v908_v35 }
 0x288   : > { %v717_v38 = vadd.f32 %v910_v37, %v613_v34  ;;  %v911_v39 = vpop.f32.mrb[26].mxu1 }
 0x289   : > { %v912_v40 = vpop.f32.mrb[27].mxu1 }
 0x28a   : > { %756 = vst.msk [vmem:[%s1602_s10] sm:$0xff] %vm755_vm0, %v717_v38  ;;  %v913_v42 = vadd.f32 %v912_v40, %v911_v39 }
 0x28c   : > { %v722_v43 = vadd.f32 %v913_v42, %v618_v41  ;;  %v914_v44 = vpop.f32.mrb[28].mxu1 }
 0x28d   : > { %v915_v46 = vpop.f32.mrb[29].mxu1 }
 0x28e   : > { %757 = vst.msk [vmem:[%s1602_s10 + $0x8] sm:$0xff] %vm755_vm0, %v722_v43  ;;  %v916_v47 = vadd.f32 %v915_v46, %v914_v44 }
 0x290   : > { %v727_v48 = vadd.f32 %v916_v47, %v623_v45  ;;  %v917_v49 = vpop.f32.mrb[30].mxu1 }
 0x291   : > { %v918_v51 = vpop.f32.mrb[31].mxu1 }
 0x292   : > { %758 = vst.msk [vmem:[%s1602_s10 + $0x10] sm:$0xff] %vm755_vm0, %v727_v48  ;;  %v919_v53 = vadd.f32 %v918_v51, %v917_v49 }
 0x294   : > { %v920_v59 = vpop.f32.mrb[32].mxu1  ;;  %v732_v60 = vadd.f32 %v919_v53, %v628_v56 }
 0x295   : > { %v921_v61 = vpop.f32.mrb[33].mxu1 }
 0x296   : > { %759 = vst.msk [vmem:[%s1602_s10 + $0x18] sm:$0xff] %vm755_vm0, %v732_v60  ;;  %v922_v63 = vadd.f32 %v921_v61, %v920_v59 }
 0x298   : > { %v923_v2 = vpop.f32.mrb[34].mxu1  ;;  %v737_v3 = vadd.f32 %v922_v63, %v633_v0 }
 0x299   : > { %v924_v4 = vpop.f32.mrb[35].mxu1 }
 0x29a   : > { %v925_v7 = vadd.f32 %v924_v4, %v923_v2  ;;  %760 = vst.msk [vmem:[%s1602_s10 + $0x20] sm:$0xff] %vm755_vm0, %v737_v3 }
 0x29c   : > { %v926_v11 = vpop.f32.mrb[36].mxu1  ;;  %v742_v12 = vadd.f32 %v925_v7, %v638_v10 }
 0x29d   : > { %v927_v13 = vpop.f32.mrb[37].mxu1 }
 0x29e   : > { %761 = vst.msk [vmem:[%s1602_s10 + $0x28] sm:$0xff] %vm755_vm0, %v742_v12  ;;  %v928_v14 = vadd.f32 %v927_v13, %v926_v11 }
 0x2a0   : > { %v929_v16 = vpop.f32.mrb[38].mxu1  ;;  %v747_v17 = vadd.f32 %v928_v14, %v643_v15 }
 0x2a1   : > { %v930_v18 = vpop.f32.mrb[39].mxu1 }
 0x2a2   : > { %v931_v19 = vadd.f32 %v930_v18, %v929_v16  ;;  %762 = vst.msk [vmem:[%s1602_s10 + $0x30] sm:$0xff] %vm755_vm0, %v747_v17 }
 0x2a4   : > { %v752_v22 = vadd.f32 %v931_v19, %v648_v21 }
 0x2a6   : > { %763 = vst.msk [vmem:[%s1602_s10 + $0x38] sm:$0xff] %vm755_vm0, %v752_v22 }
 0x2a7 PF: > { %p15_p8 = scmp.ge.s32.totalorder %s1212_s23, 4   ;;  %s1658_s18 = smov %s1145_s19 }
 0x2a8   : > { %s1659_s19 = smov %s1149_s20  ;;  %s1660_s20 = smov %s1222_s26 }
 0x2a9   : > { %s1661_s21 = smov %s1212_s23  ;;  %17 = sbr.rel (!%p15_p8) target bundleno = 3 (0x3), region = 83 }
 0x2b0   :  { %801 = vsyncpa [#allocation3], 1 }
 0x2b1   :  { %803 = vsyncpa [#allocation3 + $0x1], 1 }

</bundles_post_ra>
